<compile_context>
chip_gen: v5e
topology: v5e:2x2
jax: 0.10.0
libtpu: 0.0.40
codegen_flags: <defaults>
</compile_context>

<pallas_src>
import functools

import jax
import jax.numpy as jnp
from jax import lax
from jax.experimental import pallas as pl
from jax.experimental.pallas import tpu as pltpu


def _round_up(x, m):
    return (x + m - 1) // m * m


def _gating_kernel(x_ref, wg_ref, wv_ref, wo_ref, o_ref, acc_ref, *, activation):
    """One (token-tile, hidden-tile) step of the gated FFN."""
    h_idx = pl.program_id(1)

    @pl.when(h_idx == 0)
    def _init():
        acc_ref[...] = jnp.zeros_like(acc_ref)

    x = x_ref[...]                               # (tm, dim)
    # F.linear(x, W) == x @ W.T : contract the `dim` axis of both operands.
    dn_in = (((1,), (1,)), ((), ()))
    gate = lax.dot_general(x, wg_ref[...], dn_in,
                           preferred_element_type=jnp.float32)    # (tm, th)
    val = lax.dot_general(x, wv_ref[...], dn_in,
                          preferred_element_type=jnp.float32)     # (tm, th)

    g = activation(gate) * val                   # f32 gating math (VPU/EUP)

    # y += g @ W_out[:, h-tile].T : W_out block is (dim, th); contract th.
    wo = wo_ref[...]
    acc_ref[...] += lax.dot_general(g.astype(wo.dtype), wo,
                                    (((1,), (1,)), ((), ())),
                                    preferred_element_type=jnp.float32)

    @pl.when(h_idx == pl.num_programs(1) - 1)
    def _finalize():
        o_ref[...] = acc_ref[...].astype(o_ref.dtype)


def activation_gating(x, w_in, w_out, activation=jax.nn.silu, *, tm=None, th=None):
    """SwiGLU-style gated FFN.

    x:     (B, S, dim)
    w_in:  (2*hidden, dim)   -- nn.Linear(dim, 2*hidden, bias=False).weight
    w_out: (dim, hidden)     -- nn.Linear(hidden, dim, bias=False).weight
    """
    B, S, dim = x.shape
    two_hidden, dim_in = w_in.shape
    assert dim_in == dim
    hidden = two_hidden // 2
    assert w_out.shape == (dim, hidden)
    out_dtype = x.dtype

    M = B * S

    # ---- tile sizes ------------------------------------------------------
    if tm is None:
        # 256 fills the v6e/v7x 256x256 MXU M dimension; small M stays 1 tile.
        tm = 256 if M > 512 else _round_up(M, 8)
    if th is None:
        if hidden <= 512:
            th = _round_up(hidden, 8)            # whole hidden dim in one tile
        else:
            th = next((c for c in (512, 256, 128) if hidden % c == 0), 512)

    m_pad = _round_up(M, tm)
    h_pad = _round_up(hidden, th)

    # ---- prepare inputs (avoid weight copies whenever possible) ----------
    x2d = x.reshape(M, dim)
    if x2d.dtype != w_in.dtype:                  # matmul operands in weight dtype
        x2d = x2d.astype(w_in.dtype)
    if m_pad != M:
        x2d = jnp.pad(x2d, ((0, m_pad - M), (0, 0)))

    if h_pad == hidden:
        # Zero-copy: pass W_in twice; the gate half occupies hidden-blocks
        # [0, nh), the value half blocks [nh, 2*nh) of the same HBM buffer.
        nh = hidden // th
        w_gate, w_val, w_out_p = w_in, w_in, w_out
        gate_map = lambda i, h: (h, 0)
        val_map = lambda i, h: (nh + h, 0)
    else:
        # Fallback: hidden not tileable -> zero-pad.  Safe: padded hidden
        # columns give activation(0) * 0 and hit zero rows of W_out.
        pad = h_pad - hidden
        w_gate = jnp.pad(w_in[:hidden], ((0, pad), (0, 0)))
        w_val = jnp.pad(w_in[hidden:], ((0, pad), (0, 0)))
        w_out_p = jnp.pad(w_out, ((0, 0), (0, pad)))
        gate_map = lambda i, h: (h, 0)
        val_map = lambda i, h: (h, 0)

    grid = (m_pad // tm, h_pad // th)

    # ---- VMEM budget / scheduler hints ------------------------------------
    xb = x2d.dtype.itemsize
    wb = w_in.dtype.itemsize
    ob = jnp.dtype(out_dtype).itemsize
    vmem_est = (2 * tm * dim * xb                # x block (double-buffered)
                + 2 * 2 * th * dim * wb          # gate + value weight blocks
                + 2 * dim * th * wb              # W_out block
                + 2 * tm * dim * ob              # output block
                + tm * dim * 4)                  # f32 accumulator scratch
    vmem_limit = max(int(vmem_est * 1.4), 32 * 1024 * 1024)
    try:
        phys = pltpu.get_tpu_info().vmem_capacity_bytes
        vmem_limit = min(vmem_limit, int(phys * 0.9))
    except Exception:
        vmem_limit = min(vmem_limit, 96 * 1024 * 1024)

    cost = pl.CostEstimate(
        flops=int(6 * M * dim * hidden),
        transcendentals=int(M * hidden),
        bytes_accessed=int(M * dim * xb + w_in.size * wb + w_out.size * wb
                           + M * dim * ob),
    )

    kernel = functools.partial(_gating_kernel, activation=activation)

    out2d = pl.pallas_call(
        kernel,
        out_shape=jax.ShapeDtypeStruct((m_pad, dim), out_dtype),
        grid_spec=pltpu.PrefetchScalarGridSpec(
            num_scalar_prefetch=0,
            grid=grid,
            in_specs=[
                pl.BlockSpec((tm, dim), lambda i, h: (i, 0)),    # x rows
                pl.BlockSpec((th, dim), gate_map),               # W_in gate half
                pl.BlockSpec((th, dim), val_map),                # W_in value half
                pl.BlockSpec((dim, th), lambda i, h: (0, h)),    # W_out column tile
            ],
            out_specs=pl.BlockSpec((tm, dim), lambda i, h: (i, 0)),
            scratch_shapes=[pltpu.VMEM((tm, dim), jnp.float32)],
        ),
        compiler_params=pltpu.CompilerParams(
            dimension_semantics=("parallel", "arbitrary"),
            vmem_limit_bytes=vmem_limit,
        ),
        cost_estimate=cost,
    )(x2d, w_gate, w_val, w_out_p)

    if m_pad != M:
        out2d = out2d[:M]
    return out2d.reshape(B, S, dim)


def _reference(x, w_in, w_out, activation=jax.nn.silu):
    """Pure-JAX mirror of gating_forward_kernel (for validation)."""
    B, S, dim = x.shape
    hidden = w_in.shape[0] // 2
    h = jnp.einsum("bsd,hd->bsh", x, w_in)            # F.linear(x, W_in)
    h = h.reshape(B, S, 2, hidden)
    g = activation(h[..., 0, :]) * h[..., 1, :]
    return jnp.einsum("bsh,dh->bsd", g, w_out)        # F.linear(g, W_out)


if __name__ == "__main__":
    key = jax.random.PRNGKey(0)
    k1, k2, k3, k4, k5, k6 = jax.random.split(key, 6)

    # --- Test 1: module-consistent toy shapes, f32 -------------------------
    dim = 32
    dim_feedforward = 48                      # != 4*dim -> hidden = 2*ffw//3
    hidden = 2 * dim_feedforward // 3         # = 32
    B, S = 2, 8
    x = jax.random.normal(k1, (B, S, dim), dtype=jnp.float32)
    w_in = jax.random.normal(k2, (2 * hidden, dim), dtype=jnp.float32) * 0.05
    w_out = jax.random.normal(k3, (dim, hidden), dtype=jnp.float32) * 0.05

    y = jax.block_until_ready(activation_gating(x, w_in, w_out, activation=jax.nn.silu))
    y_ref = _reference(x, w_in, w_out, activation=jax.nn.silu)
    assert y.shape == (B, S, dim)
    assert jnp.allclose(y, y_ref, atol=1e-5, rtol=1e-5), "f32 mismatch vs reference"

    # --- Test 2: bf16 operands, exercises token AND hidden tiling ----------
    dim2, hidden2 = 128, 768                  # dim_feedforward=1152 -> hidden=768
    B2, S2 = 2, 512                           # M = 1024 -> 4 token tiles of 256
    xb16 = jax.random.normal(k4, (B2, S2, dim2), dtype=jnp.float32).astype(jnp.bfloat16)
    w_in2 = (jax.random.normal(k5, (2 * hidden2, dim2), dtype=jnp.float32) * 0.02
             ).astype(jnp.bfloat16)
    w_out2 = (jax.random.normal(k6, (dim2, hidden2), dtype=jnp.float32) * 0.02
              ).astype(jnp.bfloat16)

    y2 = jax.block_until_ready(
        activation_gating(xb16, w_in2, w_out2, activation=jax.nn.silu))
    y2_ref = _reference(xb16.astype(jnp.float32), w_in2.astype(jnp.float32),
                        w_out2.astype(jnp.float32), activation=jax.nn.silu)
    assert y2.shape == (B2, S2, dim2)
    assert jnp.allclose(y2.astype(jnp.float32), y2_ref, atol=5e-3, rtol=5e-2), \
        "bf16 mismatch vs reference"

    print("KERNEL_OK")
</pallas_src>

<mosaic_0001>
module attributes {stable_mosaic.version = 11 : i64} {
  func.func @_gating_kernel(%arg0: i32, %arg1: i32, %arg2: memref<16x32xf32, #tpu.memory_space<vmem>>, %arg3: memref<32x32xf32, #tpu.memory_space<vmem>>, %arg4: memref<32x32xf32, #tpu.memory_space<vmem>>, %arg5: memref<32x32xf32, #tpu.memory_space<vmem>>, %arg6: memref<16x32xf32, #tpu.memory_space<vmem>>, %arg7: memref<16x32xf32, #tpu.memory_space<vmem>>) attributes {dimension_semantics = [#tpu.dimension_semantics<parallel>, #tpu.dimension_semantics<arbitrary>], iteration_bounds = array<i64: 1, 1>, scalar_prefetch = 0 : i64, scratch_operands = 1 : i64, tpu.core_type = #tpu.core_type<tc>, window_params = [{transform_indices = @transform_0, window_bounds = array<i64: 16, 32>}, {transform_indices = @transform_1, window_bounds = array<i64: 32, 32>}, {transform_indices = @transform_2, window_bounds = array<i64: 32, 32>}, {transform_indices = @transform_3, window_bounds = array<i64: 32, 32>}, {transform_indices = @transform_4, window_bounds = array<i64: 16, 32>}]} {
    %c0_i32 = arith.constant 0 : i32
    %0 = arith.cmpi eq, %arg1, %c0_i32 : i32
    %1 = arith.extui %0 : i1 to i32
    %c0_i32_0 = arith.constant 0 : i32
    %2 = arith.cmpi ne, %1, %c0_i32_0 : i32
    scf.if %2 {
      %cst_17 = arith.constant 0.000000e+00 : f32
      %23 = vector.broadcast %cst_17 : f32 to vector<16x32xf32>
      %c0_18 = arith.constant 0 : index
      %c0_19 = arith.constant 0 : index
      %24 = vector.load %arg7[%c0_18, %c0_19] : memref<16x32xf32, #tpu.memory_space<vmem>>, vector<16x32xf32>
      tpu.vector_store %arg7[%c0_18, %c0_19], %23 {strides = array<i32>} : memref<16x32xf32, #tpu.memory_space<vmem>>, vector<16x32xf32>,
    } else {
    }
    %c0 = arith.constant 0 : index
    %c0_1 = arith.constant 0 : index
    %3 = vector.load %arg2[%c0, %c0_1] : memref<16x32xf32, #tpu.memory_space<vmem>>, vector<16x32xf32>
    %c0_2 = arith.constant 0 : index
    %c0_3 = arith.constant 0 : index
    %4 = vector.load %arg3[%c0_2, %c0_3] : memref<32x32xf32, #tpu.memory_space<vmem>>, vector<32x32xf32>
    %cst = arith.constant dense<0.000000e+00> : vector<16x32xf32>
    %5 = tpu.matmul %3, %4, %cst {dimension_numbers = #tpu.dot_dimension_numbers<[1], [1], [0], [0], [0, 0, 1, 0], [], []>} : vector<16x32xf32>, vector<32x32xf32>, vector<16x32xf32> -> vector<16x32xf32>
    %c0_4 = arith.constant 0 : index
    %c0_5 = arith.constant 0 : index
    %6 = vector.load %arg4[%c0_4, %c0_5] : memref<32x32xf32, #tpu.memory_space<vmem>>, vector<32x32xf32>
    %cst_6 = arith.constant dense<0.000000e+00> : vector<16x32xf32>
    %7 = tpu.matmul %3, %6, %cst_6 {dimension_numbers = #tpu.dot_dimension_numbers<[1], [1], [0], [0], [0, 0, 1, 0], [], []>} : vector<16x32xf32>, vector<32x32xf32>, vector<16x32xf32> -> vector<16x32xf32>
    %8 = arith.negf %5 : vector<16x32xf32>
    %9 = math.exp %8 : vector<16x32xf32>
    %cst_7 = arith.constant 1.000000e+00 : f32
    %10 = vector.broadcast %cst_7 : f32 to vector<16x32xf32>
    %11 = arith.addf %10, %9 : vector<16x32xf32>
    %12 = arith.divf %10, %11 : vector<16x32xf32>
    %13 = arith.mulf %5, %12 : vector<16x32xf32>
    %14 = arith.mulf %13, %7 : vector<16x32xf32>
    %c0_8 = arith.constant 0 : index
    %c0_9 = arith.constant 0 : index
    %15 = vector.load %arg5[%c0_8, %c0_9] : memref<32x32xf32, #tpu.memory_space<vmem>>, vector<32x32xf32>
    %c0_10 = arith.constant 0 : index
    %c0_11 = arith.constant 0 : index
    %16 = vector.load %arg7[%c0_10, %c0_11] : memref<16x32xf32, #tpu.memory_space<vmem>>, vector<16x32xf32>
    %cst_12 = arith.constant dense<0.000000e+00> : vector<16x32xf32>
    %17 = tpu.matmul %14, %15, %cst_12 {dimension_numbers = #tpu.dot_dimension_numbers<[1], [1], [0], [0], [0, 0, 1, 0], [], []>} : vector<16x32xf32>, vector<32x32xf32>, vector<16x32xf32> -> vector<16x32xf32>
    %18 = arith.addf %16, %17 : vector<16x32xf32>
    %c0_13 = arith.constant 0 : index
    %c0_14 = arith.constant 0 : index
    %19 = vector.load %arg7[%c0_13, %c0_14] : memref<16x32xf32, #tpu.memory_space<vmem>>, vector<16x32xf32>
    tpu.vector_store %arg7[%c0_13, %c0_14], %18 {strides = array<i32>} : memref<16x32xf32, #tpu.memory_space<vmem>>, vector<16x32xf32>,
    %c0_i32_15 = arith.constant 0 : i32
    %20 = arith.cmpi eq, %arg1, %c0_i32_15 : i32
    %21 = arith.extui %20 : i1 to i32
    %c0_i32_16 = arith.constant 0 : i32
    %22 = arith.cmpi ne, %21, %c0_i32_16 : i32
    scf.if %22 {
      %c0_17 = arith.constant 0 : index
      %c0_18 = arith.constant 0 : index
      %23 = vector.load %arg7[%c0_17, %c0_18] : memref<16x32xf32, #tpu.memory_space<vmem>>, vector<16x32xf32>
      %c0_19 = arith.constant 0 : index
      %c0_20 = arith.constant 0 : index
      %24 = vector.load %arg6[%c0_19, %c0_20] : memref<16x32xf32, #tpu.memory_space<vmem>>, vector<16x32xf32>
      tpu.vector_store %arg6[%c0_19, %c0_20], %23 {strides = array<i32>} : memref<16x32xf32, #tpu.memory_space<vmem>>, vector<16x32xf32>,
    } else {
    }
    return
  }
  func.func @transform_0(%arg0: i32, %arg1: i32) -> (i32, i32) {
    %c0_i32 = arith.constant 0 : i32
    %c0_i32_0 = arith.constant 0 : i32
    return %arg0, %c0_i32 : i32, i32
  }
  func.func @transform_1(%arg0: i32, %arg1: i32) -> (i32, i32) {
    %c0_i32 = arith.constant 0 : i32
    %c0_i32_0 = arith.constant 0 : i32
    return %arg1, %c0_i32 : i32, i32
  }
  func.func @transform_2(%arg0: i32, %arg1: i32) -> (i32, i32) {
    %c1_i32 = arith.constant 1 : i32
    %0 = arith.addi %c1_i32, %arg1 : i32
    %c0_i32 = arith.constant 0 : i32
    %c0_i32_0 = arith.constant 0 : i32
    return %0, %c0_i32 : i32, i32
  }
  func.func @transform_3(%arg0: i32, %arg1: i32) -> (i32, i32) {
    %c0_i32 = arith.constant 0 : i32
    %c0_i32_0 = arith.constant 0 : i32
    return %c0_i32, %arg1 : i32, i32
  }
  func.func @transform_4(%arg0: i32, %arg1: i32) -> (i32, i32) {
    %c0_i32 = arith.constant 0 : i32
    %c0_i32_0 = arith.constant 0 : i32
    return %arg0, %c0_i32 : i32, i32
  }
}

</mosaic_0001>

<bundles_post_ra>
// kernel: tpu_custom_call.1
= control target key start
LH: loop header
LB: loop body
LE: loop exit
PB: predicated region body
PF: predicated region fallthrough
CT: control target
= control target key end

     0   :  { %vm44_vm0 = vcmask 261120   ;;  %s426_s0 = inlined_call_operand.vmem [shape: f32[16,32], index: 0, kind: input, shape index: {}]   ;;  %s427_s1 = inlined_call_operand.vmem [shape: f32[64,32], index: 1, kind: input, shape index: {}]   ;;  %s428_s2 = inlined_call_operand.vmem [shape: f32[64,32], index: 2, kind: input, shape index: {}]   ;;  %s429_s3 = inlined_call_operand.vmem [shape: f32[32,32], index: 3, kind: input, shape index: {}]   ;;  %s430_s4 = inlined_call_operand.hbm [shape: f32[16,32], index: 4, kind: output, shape index: {}]  }
   0x1   :  { %v52_v0 = vld [vmem:[%s427_s1 + $0x18] sm:$0xff]  ;;  %v51_v1 = vld [vmem:[%s427_s1 + $0x10] sm:$0xff] }
   0x2   :  { %258 = vmatpush.xpose.msk.msra.mxu0 %vm44_vm0, %v52_v0  ;;  %282 = vmatpush.xpose.msk.msra.mxu3 %vm44_vm0, %v52_v0  ;;  %v267_v2 = vld [vmem:[%s428_s2 + $0x38] sm:$0xff] }
   0x3   :  { %268 = vmatpush.xpose.msk.msra.mxu1 %vm44_vm0, %v267_v2 }
   0x4   :  { %9 = vsyncpa [#allocation4], 0  ;;  %v266_v3 = vld [vmem:[%s428_s2 + $0x30] sm:$0xff]  ;;  %v50_v4 = vld [vmem:[%s427_s1 + $0x8] sm:$0xff]  ;;  %v324_v20 = vmov 0.0   ;;  %s240_s17 = sshll.u32 %s430_s4, 4  ;;  %s241_s17 = int_to_ptr.hbm [resolvable:$true] %s240_s17 }
   0x5   :  { %v265_v5 = vld [vmem:[%s428_s2 + $0x28] sm:$0xff]  ;;  %v49_v6 = vld [vmem:[%s427_s1] sm:$0xff]  ;;  %v179_v10 = vld [vmem:[%s429_s3 + $0x18] sm:$0xff]  ;;  %45 = vst.msk [vmem:[#allocation2] sm:$0xff] %vm44_vm0, %v324_v20  ;;  %s326_s18 = smov 128   ;;  %s327_s19 = smov 8  }
   0x6   :  { %259 = vmatpush.xpose.msk.msra.mxu0 %vm44_vm0, %v51_v1  ;;  %283 = vmatpush.xpose.msk.msra.mxu3 %vm44_vm0, %v51_v1  ;;  %v264_v7 = vld [vmem:[%s428_s2 + $0x20] sm:$0xff]  ;;  %v48_v9 = vld [vmem:[%s426_s0 + $0x8] sm:$0xff]  ;;  %v178_v11 = vld [vmem:[%s429_s3 + $0x10] sm:$0xff]  ;;  %46 = vst.msk [vmem:[#allocation2 + $0x8] sm:$0xff] %vm44_vm0, %v324_v20 }
   0x7   :  { %269 = vmatpush.xpose.msk.msra.mxu1 %vm44_vm0, %v266_v3  ;;  %v47_v8 = vld [vmem:[%s426_s0] sm:$0xff]  ;;  %276 = vmatpush.xpose.msk.msra.mxu2 %vm44_vm0, %v179_v10  ;;  %v177_v12 = vld [vmem:[%s429_s3 + $0x8] sm:$0xff] }
   0x8   :  { %v176_v13 = vld [vmem:[%s429_s3] sm:$0xff]  ;;  %s325_s3 = smov [#allocation3]  }
   0x9   :  { %s238_s14 = sshll.u32 %s325_s3, 4  ;;  %s239_s14 = int_to_ptr.vmem [resolvable:$true] %s238_s14 }
   0xa   :  { %260 = vmatpush.xpose.msk.msra.mxu0 %vm44_vm0, %v50_v4  ;;  %284 = vmatpush.xpose.msk.msra.mxu3 %vm44_vm0, %v50_v4 }
   0xb   :  { %270 = vmatpush.xpose.msk.msra.mxu1 %vm44_vm0, %v265_v5  ;;  %277 = vmatpush.xpose.msk.msra.mxu2 %vm44_vm0, %v178_v11 }
   0xc   :  { %v180_v49 = vld [vmem:[#allocation2] sm:$0xff] }
   0xd   :  { %v181_v52 = vld [vmem:[#allocation2 + $0x8] sm:$0xff] }
   0xe   :  { %261 = vmatpush.xpose.msk.msra.mxu0 %vm44_vm0, %v49_v6  ;;  %285 = vmatpush.xpose.msk.msra.mxu3 %vm44_vm0, %v49_v6 }
   0xf   :  { %271 = vmatpush.xpose.msk.msra.mxu1 %vm44_vm0, %v264_v7  ;;  %278 = vmatpush.xpose.msk.msra.mxu2 %vm44_vm0, %v177_v12 }
  0x11   :  { %262 = vmatmul.msk.f32.vlgmr.msra.gmra.mxu0 %vm44_vm0, %v47_v8  ;;  %263 = vmatmul.msk.f32.vlgmr.msra.gmra.mxu3 %vm44_vm0, %v48_v9 }
  0x12   :  { %272 = vmatmul.msk.f32.vlgmr.msra.gmra.mxu1 %vm44_vm0, %v47_v8 }
  0x13   :  { %279 = vmatpush.xpose.msk.msra.mxu2 %vm44_vm0, %v176_v13 }
  0x1a   :  { %273 = vmatmul.msk.f32.gmra.mxu1 %vm44_vm0, %v48_v9 }
  0x8e   :  { %v89_v14 = vpop.f32.mrf.mxu0 }
  0x8f   :  { %v274_v15 = vmul.f32 -1.442695, %v89_v14  ;;  %v128_v33 = vpop.f32.mrf.mxu1 }
  0x91   :  { %290 = vpow2.f32 %v274_v15 }
  0x94   :  { %v92_v16 = vpop.f32.mrf.mxu3 }
  0x95   :  { %v275_v17 = vmul.f32 -1.442695, %v92_v16 }
  0x97   :  { %v291_v18 = vpop.eup %290  ;;  %292 = vpow2.f32 %v275_v17  ;;  %v131_v47 = vpop.f32.mrf.mxu1 }
  0x98   :  { %v140_v19 = vadd.f32 1.0, %v291_v18 }
  0x9a   :  { %294 = vrcp.f32 %v140_v19  ;;  %v153_v26 = vand.u32 2147483648, %v140_v19  ;;  %v151_v28 = vand.u32 2147483647, %v140_v19  ;;  %vm147_vm2 = vweird.f32 %v140_v19 }
  0x9c   :  { %v154_v32 = vor.u32 1.1754944e-38, %v153_v26  ;;  %vm152_vm4 = vcmp.eq.f32.partialorder %v151_v28, 8.507059e+37 }
  0x9d   :  { %v293_v21 = vpop.eup %292 }
  0x9e   :  { %v141_v22 = vadd.f32 1.0, %v293_v21 }
  0xa0   :  { %v295_v23 = vpop.eup %294  ;;  %296 = vrcp.f32 %v141_v22  ;;  %v168_v37 = vand.u32 2147483648, %v141_v22  ;;  %v166_v40 = vand.u32 2147483647, %v141_v22  ;;  %vm162_vm6 = vweird.f32 %v141_v22 }
  0xa1   :  { %v143_v24 = vmul.f32 %v295_v23, %v140_v19  ;;  %vm148_vm1 = vweird.f32 %v295_v23 }
  0xa2   :  { %vm149_vm3 = vmor %vm147_vm2, %vm148_vm1  ;;  %v169_v43 = vor.u32 1.1754944e-38, %v168_v37  ;;  %vm167_vm8 = vcmp.eq.f32.partialorder %v166_v40, 8.507059e+37 }
  0xa3   :  { %v144_v25 = vsub.f32 1.0, %v143_v24 }
  0xa5   :  { %v145_v27 = vmul.f32 %v295_v23, %v144_v25 }
  0xa6   :  { %v297_v29 = vpop.eup %296 }
  0xa7   :  { %v146_v30 = vadd.f32 %v295_v23, %v145_v27  ;;  %v158_v31 = vmul.f32 %v297_v29, %v141_v22  ;;  %vm163_vm5 = vweird.f32 %v297_v29 }
  0xa8   :  { %vm164_vm7 = vmor %vm162_vm6, %vm163_vm5 }
  0xa9   :  { %v150_v34 = vsel %vm149_vm3, %v295_v23, %v146_v30  ;;  %v159_v35 = vsub.f32 1.0, %v158_v31 }
  0xaa   :  { %v155_v36 = vsel %vm152_vm4, %v154_v32, %v150_v34 }
  0xab   :  { %v172_v38 = vmul.f32 %v155_v36, %v89_v14  ;;  %v160_v39 = vmul.f32 %v297_v29, %v159_v35 }
  0xad   :  { %v161_v41 = vadd.f32 %v297_v29, %v160_v39  ;;  %v174_v42 = vmul.f32 %v172_v38, %v128_v33 }
  0xaf   :  { %v165_v44 = vsel %vm164_vm7, %v297_v29, %v161_v41  ;;  %280 = vmatmul.msk.f32.vlgmr.msra.gmra.mxu2 %vm44_vm0, %v174_v42 }
  0xb0   :  { %v170_v45 = vsel %vm167_vm8, %v169_v43, %v165_v44 }
  0xb1   :  { %v173_v46 = vmul.f32 %v170_v45, %v92_v16 }
  0xb3   :  { %v175_v48 = vmul.f32 %v173_v46, %v131_v47 }
  0xb7   :  { %281 = vmatmul.msk.f32.gmra.mxu2 %vm44_vm0, %v175_v48 }
 0x132   :  { %v217_v50 = vpop.f32.mrf.mxu2 }
 0x133   :  { %v223_v51 = vadd.f32 %v217_v50, %v180_v49 }
 0x135   :  { %225 = vst.msk [vmem:[#allocation2] sm:$0xff] %vm44_vm0, %v223_v51 }
 0x13a   :  { %v220_v53 = vpop.f32.mrf.mxu2 }
 0x13b   :  { %v224_v54 = vadd.f32 %v220_v53, %v181_v52 }
 0x13c   :  { %v230_v55 = vld [vmem:[#allocation2] sm:$0xff] }
 0x13d   :  { %226 = vst.msk [vmem:[#allocation2 + $0x8] sm:$0xff] %vm44_vm0, %v224_v54 }
 0x13e   :  { %232 = vst.msk [vmem:[#allocation3] sm:$0xff] %vm44_vm0, %v230_v55 }
 0x144   :  { %v231_v56 = vld [vmem:[#allocation2 + $0x8] sm:$0xff] }
 0x145   :  { %233 = vst.msk [vmem:[#allocation3 + $0x8] sm:$0xff] %vm44_vm0, %v231_v56 }
 0x146   :  { %246 = dma.vmem_to_hbm [thread:$0]  %s239_s14, 256, %s241_s17, [#allocation4], %s326_s18, %s326_s18, %s327_s19  }
 0x147   :  { %322 = dma.done.wait [#allocation4], 256  }
 0x148   :  { %323 = vsyncadd [#allocation4], 4294967040 }
 0x149   :  { %251 = vsyncpa [#allocation4], 1 }

</bundles_post_ra>
